<compile_context>
chip_gen: v5e
topology: v5e:2x2
jax: 0.10.0
libtpu: 0.0.40
codegen_flags: <defaults>
</compile_context>

<pallas_src>
import jax
import jax.numpy as jnp
from jax.experimental import pallas as pl
from jax.experimental.pallas import tpu as pltpu


def _pick_row_tile(n):
    # second-minor block dims must be a multiple of 8 (or the full extent)
    for t in (256, 128, 64, 32, 16, 8):
        if n % t == 0:
            return t
    return n


def _pick_col_tile(n):
    # minor block dims must be a multiple of 128 (or the full extent)
    for t in (512, 256, 128):
        if n % t == 0:
            return t
    return n


def gcn_layer_kernel(a_ref, x_ref, w_ref, b_ref, o_ref, acc_ref):
    """One (row-tile i, reduction-tile k) grid step of y = A_hat @ (x @ W) + b."""
    k = pl.program_id(1)

    @pl.when(k == 0)
    def _init():
        acc_ref[...] = jnp.zeros_like(acc_ref)

    # small linear first:  (tk, F_in) @ (F_in, F_pad) -> (tk, F_pad)
    xw = jnp.dot(x_ref[...], w_ref[...], preferred_element_type=jnp.float32)
    # aggregation over the k-th column tile of A_hat (bf16 MXU path, f32 acc)
    acc_ref[...] += jnp.dot(a_ref[...], xw.astype(a_ref.dtype),
                            preferred_element_type=jnp.float32)

    @pl.when(k == pl.num_programs(1) - 1)
    def _finalize():
        o_ref[...] = (acc_ref[...] + b_ref[...]).astype(o_ref.dtype)


def gcn_layer(adj, x, norm_in, norm_out, w, b, *, a_dtype=jnp.bfloat16):
    """GCNLayer forward.

    adj      : (N, N) dense adjacency, adj[dst, src] = 1 (self loops included)
    x        : (N, F_in) node features
    norm_in  : (N,) in_degree^-0.5, norm_out: (N,) out_degree^-0.5
    w, b     : Linear(F_in, F_out) params, w (F_out, F_in), b (F_out,)
    returns  : (N, F_out) float32
    """
    n, f_in = x.shape
    f_out = w.shape[0]
    f_pad = max(128, ((f_out + 127) // 128) * 128)   # lane-dense output width

    # Fold both degree norms into the adjacency (commutes with the right-
    # multiply by W) and cast the O(N^2) operand to bf16.
    a_hat = (norm_out[:, None] * adj * norm_in[None, :]).astype(a_dtype)

    # Pad the linear layer to the lane-dense width; padded columns are zero.
    w_pad = jnp.zeros((f_in, f_pad), jnp.float32).at[:, :f_out].set(w.T)
    b_pad = jnp.zeros((1, f_pad), jnp.float32).at[:, :f_out].set(b[None, :])

    tm = _pick_row_tile(n)
    tk = _pick_col_tile(n)
    grid_i, grid_k = n // tm, n // tk

    a_bytes = jnp.dtype(a_dtype).itemsize
    # double-buffered streams + resident params + f32 accumulator, 2x headroom
    vmem_bytes = (2 * tm * tk * a_bytes + 2 * tk * f_in * 4
                  + 2 * tm * f_pad * 4 + f_in * f_pad * 4 + f_pad * 4
                  + tm * f_pad * 4)
    vmem_limit = int(min(max(2 * vmem_bytes, 4 * 1024 * 1024),
                         48 * 1024 * 1024))   # stay under v7x's 64 MiB VMEM

    cost = pl.CostEstimate(
        flops=2 * n * n * f_pad + 2 * grid_i * n * f_in * f_pad,
        transcendentals=0,
        bytes_accessed=(n * n * a_bytes + grid_i * n * f_in * 4
                        + grid_i * grid_k * f_in * f_pad * 4 + n * f_pad * 4),
    )

    out_pad = pl.pallas_call(
        gcn_layer_kernel,
        out_shape=jax.ShapeDtypeStruct((n, f_pad), jnp.float32),
        grid_spec=pltpu.PrefetchScalarGridSpec(
            num_scalar_prefetch=0,
            grid=(grid_i, grid_k),
            in_specs=[
                pl.BlockSpec((tm, tk), lambda i, k: (i, k)),        # A_hat tile
                pl.BlockSpec((tk, f_in), lambda i, k: (k, 0)),      # x tile
                pl.BlockSpec((f_in, f_pad), lambda i, k: (0, 0)),   # W (resident)
                pl.BlockSpec((1, f_pad), lambda i, k: (0, 0)),      # bias
            ],
            out_specs=pl.BlockSpec((tm, f_pad), lambda i, k: (i, 0)),
            scratch_shapes=[pltpu.VMEM((tm, f_pad), jnp.float32)],
        ),
        compiler_params=pltpu.CompilerParams(
            dimension_semantics=("parallel", "arbitrary"),
            vmem_limit_bytes=vmem_limit,
        ),
        cost_estimate=cost,
    )(a_hat, x, w_pad, b_pad)

    return out_pad[:, :f_out]


def build_graph(n, key):
    """Deterministic directed graph (no self loops) as dense A[dst, src]."""
    src = jnp.arange(n)
    a = jnp.zeros((n, n), jnp.float32).at[(src + 1) % n, src].set(1.0)   # ring
    # extra pseudo-random edges; accidental self loops are redirected onto the
    # (already present) ring edge so they are harmless
    k1, k2 = jax.random.split(key)
    es = jax.random.randint(k1, (2 * n,), 0, n)
    ed = jax.random.randint(k2, (2 * n,), 0, n)
    ed = jnp.where(ed == es, (es + 1) % n, ed)
    a = a.at[ed, es].set(1.0)
    return a


if __name__ == "__main__":
    key = jax.random.PRNGKey(0)
    k_graph, k_x, k_w, k_b = jax.random.split(key, 4)

    # NOTE: at these shapes the kernel is launch-overhead bound (MXU underfill);
    # for real workloads batch many graphs / layers into one pallas_call.
    N, F_IN, F_OUT = 64, 32, 16

    adj = build_graph(N, k_graph)
    adj = adj.at[jnp.arange(N), jnp.arange(N)].set(1.0)      # add_self_loop=True

    in_deg = jnp.maximum(adj.sum(axis=1), 1.0)               # edges into each dst
    out_deg = jnp.maximum(adj.sum(axis=0), 1.0)              # edges out of each src
    norm_in = jnp.power(in_deg, -0.5).astype(jnp.float32)
    norm_out = jnp.power(out_deg, -0.5).astype(jnp.float32)

    x = jax.random.normal(k_x, (N, F_IN), dtype=jnp.float32)

    bound = 1.0 / (F_IN ** 0.5)                               # PyTorch Linear init
    w = jax.random.uniform(k_w, (F_OUT, F_IN), minval=-bound, maxval=bound,
                           dtype=jnp.float32)
    b = jax.random.uniform(k_b, (F_OUT,), minval=-bound, maxval=bound,
                           dtype=jnp.float32)

    out = gcn_layer(adj, x, norm_in, norm_out, w, b)
    out = jax.block_until_ready(out)
    assert out.shape == (N, F_OUT)

    # Exact f32 semantics of the PyTorch module (norm scale, copy_u/sum, linear).
    ref_f32 = ((adj @ (x * norm_in[:, None])) * norm_out[:, None]) @ w.T + b
    # Reference mirroring the kernel's bf16 adjacency / bf16 xw fast path.
    a_hat = (norm_out[:, None] * adj * norm_in[None, :]).astype(jnp.bfloat16)
    xw = (x @ w.T).astype(jnp.bfloat16)
    ref_bf16 = jnp.dot(a_hat, xw, preferred_element_type=jnp.float32) + b

    assert jnp.allclose(out, ref_bf16, atol=1e-2, rtol=1e-2), \
        float(jnp.max(jnp.abs(out - ref_bf16)))
    assert jnp.allclose(out, ref_f32, atol=5e-2, rtol=5e-2), \
        float(jnp.max(jnp.abs(out - ref_f32)))

    print("KERNEL_OK")
</pallas_src>

<mosaic_0001>
module attributes {stable_mosaic.version = 11 : i64} {
  func.func @gcn_layer_kernel(%arg0: i32, %arg1: i32, %arg2: memref<64x64xbf16, #tpu.memory_space<vmem>>, %arg3: memref<64x32xf32, #tpu.memory_space<vmem>>, %arg4: memref<32x128xf32, #tpu.memory_space<vmem>>, %arg5: memref<1x128xf32, #tpu.memory_space<vmem>>, %arg6: memref<64x128xf32, #tpu.memory_space<vmem>>, %arg7: memref<64x128xf32, #tpu.memory_space<vmem>>) attributes {dimension_semantics = [#tpu.dimension_semantics<parallel>, #tpu.dimension_semantics<arbitrary>], iteration_bounds = array<i64: 1, 1>, scalar_prefetch = 0 : i64, scratch_operands = 1 : i64, tpu.core_type = #tpu.core_type<tc>, window_params = [{transform_indices = @transform_0, window_bounds = array<i64: 64, 64>}, {transform_indices = @transform_1, window_bounds = array<i64: 64, 32>}, {pipeline_mode = #tpu.pipeline_mode<synchronous>, transform_indices = @transform_2, window_bounds = array<i64: 32, 128>}, {pipeline_mode = #tpu.pipeline_mode<synchronous>, transform_indices = @transform_3, window_bounds = array<i64: 1, 128>}, {transform_indices = @transform_4, window_bounds = array<i64: 64, 128>}]} {
    %c0_i32 = arith.constant 0 : i32
    %0 = arith.cmpi eq, %arg1, %c0_i32 : i32
    %1 = arith.extui %0 : i1 to i32
    %c0_i32_0 = arith.constant 0 : i32
    %2 = arith.cmpi ne, %1, %c0_i32_0 : i32
    scf.if %2 {
      %cst_13 = arith.constant 0.000000e+00 : f32
      %15 = vector.broadcast %cst_13 : f32 to vector<64x128xf32>
      %c0_14 = arith.constant 0 : index
      %c0_15 = arith.constant 0 : index
      %16 = vector.load %arg7[%c0_14, %c0_15] : memref<64x128xf32, #tpu.memory_space<vmem>>, vector<64x128xf32>
      tpu.vector_store %arg7[%c0_14, %c0_15], %15 {strides = array<i32>} : memref<64x128xf32, #tpu.memory_space<vmem>>, vector<64x128xf32>,
    } else {
    }
    %c0 = arith.constant 0 : index
    %c0_1 = arith.constant 0 : index
    %3 = vector.load %arg3[%c0, %c0_1] : memref<64x32xf32, #tpu.memory_space<vmem>>, vector<64x32xf32>
    %c0_2 = arith.constant 0 : index
    %c0_3 = arith.constant 0 : index
    %4 = vector.load %arg4[%c0_2, %c0_3] : memref<32x128xf32, #tpu.memory_space<vmem>>, vector<32x128xf32>
    %cst = arith.constant dense<0.000000e+00> : vector<64x128xf32>
    %5 = tpu.matmul %3, %4, %cst {dimension_numbers = #tpu.dot_dimension_numbers<[1], [0], [0], [1], [0, 0, 1, 1], [], []>} : vector<64x32xf32>, vector<32x128xf32>, vector<64x128xf32> -> vector<64x128xf32>
    %c0_4 = arith.constant 0 : index
    %c0_5 = arith.constant 0 : index
    %6 = vector.load %arg7[%c0_4, %c0_5] : memref<64x128xf32, #tpu.memory_space<vmem>>, vector<64x128xf32>
    %c0_6 = arith.constant 0 : index
    %c0_7 = arith.constant 0 : index
    %7 = vector.load %arg2[%c0_6, %c0_7] : memref<64x64xbf16, #tpu.memory_space<vmem>>, vector<64x64xbf16>
    %8 = arith.truncf %5 : vector<64x128xf32> to vector<64x128xbf16>
    %cst_8 = arith.constant dense<0.000000e+00> : vector<64x128xf32>
    %9 = tpu.matmul %7, %8, %cst_8 {dimension_numbers = #tpu.dot_dimension_numbers<[1], [0], [0], [1], [0, 0, 1, 1], [], []>} : vector<64x64xbf16>, vector<64x128xbf16>, vector<64x128xf32> -> vector<64x128xf32>
    %10 = arith.addf %6, %9 : vector<64x128xf32>
    %c0_9 = arith.constant 0 : index
    %c0_10 = arith.constant 0 : index
    %11 = vector.load %arg7[%c0_9, %c0_10] : memref<64x128xf32, #tpu.memory_space<vmem>>, vector<64x128xf32>
    tpu.vector_store %arg7[%c0_9, %c0_10], %10 {strides = array<i32>} : memref<64x128xf32, #tpu.memory_space<vmem>>, vector<64x128xf32>,
    %c0_i32_11 = arith.constant 0 : i32
    %12 = arith.cmpi eq, %arg1, %c0_i32_11 : i32
    %13 = arith.extui %12 : i1 to i32
    %c0_i32_12 = arith.constant 0 : i32
    %14 = arith.cmpi ne, %13, %c0_i32_12 : i32
    scf.if %14 {
      %c0_13 = arith.constant 0 : index
      %c0_14 = arith.constant 0 : index
      %15 = vector.load %arg7[%c0_13, %c0_14] : memref<64x128xf32, #tpu.memory_space<vmem>>, vector<64x128xf32>
      %c0_15 = arith.constant 0 : index
      %c0_16 = arith.constant 0 : index
      %16 = vector.load %arg5[%c0_15, %c0_16] : memref<1x128xf32, #tpu.memory_space<vmem>>, vector<1x128xf32>
      %17 = vector.broadcast %16 : vector<1x128xf32> to vector<64x128xf32>
      %18 = arith.addf %15, %17 : vector<64x128xf32>
      %c0_17 = arith.constant 0 : index
      %c0_18 = arith.constant 0 : index
      %19 = vector.load %arg6[%c0_17, %c0_18] : memref<64x128xf32, #tpu.memory_space<vmem>>, vector<64x128xf32>
      tpu.vector_store %arg6[%c0_17, %c0_18], %18 {strides = array<i32>} : memref<64x128xf32, #tpu.memory_space<vmem>>, vector<64x128xf32>,
    } else {
    }
    return
  }
  func.func @transform_0(%arg0: i32, %arg1: i32) -> (i32, i32) {
    %c0_i32 = arith.constant 0 : i32
    return %arg0, %arg1 : i32, i32
  }
  func.func @transform_1(%arg0: i32, %arg1: i32) -> (i32, i32) {
    %c0_i32 = arith.constant 0 : i32
    %c0_i32_0 = arith.constant 0 : i32
    return %arg1, %c0_i32 : i32, i32
  }
  func.func @transform_2(%arg0: i32, %arg1: i32) -> (i32, i32) {
    %c0_i32 = arith.constant 0 : i32
    %c0_i32_0 = arith.constant 0 : i32
    %c0_i32_1 = arith.constant 0 : i32
    return %c0_i32, %c0_i32_0 : i32, i32
  }
  func.func @transform_3(%arg0: i32, %arg1: i32) -> (i32, i32) {
    %c0_i32 = arith.constant 0 : i32
    %c0_i32_0 = arith.constant 0 : i32
    %c0_i32_1 = arith.constant 0 : i32
    return %c0_i32, %c0_i32_0 : i32, i32
  }
  func.func @transform_4(%arg0: i32, %arg1: i32) -> (i32, i32) {
    %c0_i32 = arith.constant 0 : i32
    %c0_i32_0 = arith.constant 0 : i32
    return %arg0, %c0_i32 : i32, i32
  }
}

</mosaic_0001>

<bundles_post_ra>
// kernel: tpu_custom_call.1
= control target key start
LH: loop header
LB: loop body
LE: loop exit
PB: predicated region body
PF: predicated region fallthrough
CT: control target
= control target key end

     0   :  { %s416_s0 = inlined_call_operand.vmem [shape: bf16[64,64], index: 0, kind: input, shape index: {}]   ;;  %s417_s1 = inlined_call_operand.vmem [shape: f32[64,32], index: 1, kind: input, shape index: {}]   ;;  %s418_s2 = inlined_call_operand.vmem [shape: f32[32,128], index: 2, kind: input, shape index: {}]   ;;  %s419_s3 = inlined_call_operand.vmem [shape: f32[1,128], index: 3, kind: input, shape index: {}]   ;;  %s420_s4 = inlined_call_operand.hbm [shape: f32[64,128], index: 4, kind: output, shape index: {}]  }
   0x1   :  { %v42_v0 = vld [vmem:[%s418_s2 + $0x18] sm:$0xff]  ;;  %v41_v1 = vld [vmem:[%s418_s2 + $0x10] sm:$0xff]  ;;  %v40_v2 = vld [vmem:[%s418_s2 + $0x8] sm:$0xff] }
   0x2   :  { %80 = vmatpush.msra.mxu0 %v42_v0  ;;  %288 = vmatpush.msra.mxu3 %v42_v0  ;;  %v39_v3 = vld [vmem:[%s418_s2] sm:$0xff] }
   0x4   :  { %81 = vmatpush.msra.mxu0 %v41_v1  ;;  %289 = vmatpush.msra.mxu3 %v41_v1 }
   0x5   :  { %9 = vsyncpa [#allocation4], 0  ;;  %v31_v4 = vld [vmem:[%s417_s1] sm:$0xff]  ;;  %vm43_vm0 = vcmask 261120   ;;  %v36_v5 = vld [vmem:[%s417_s1 + $0x28] sm:$0xff]  ;;  %vm149_vm1 = vcmask 523264  }
   0x6   :  { %82 = vmatpush.msra.mxu0 %v40_v2  ;;  %290 = vmatpush.msra.mxu3 %v40_v2  ;;  %v32_v6 = vld [vmem:[%s417_s1 + $0x8] sm:$0xff]  ;;  %v37_v7 = vld [vmem:[%s417_s1 + $0x30] sm:$0xff]  ;;  %v38_v9 = vld [vmem:[%s417_s1 + $0x38] sm:$0xff]  ;;  %s244_s23 = sshll.u32 %s420_s4, 4  ;;  %s327_s24 = smov 128   ;;  %s245_s23 = int_to_ptr.hbm [resolvable:$true] %s244_s23 }
   0x7   :  { %v33_v8 = vld [vmem:[%s417_s1 + $0x10] sm:$0xff]  ;;  %v34_v10 = vld [vmem:[%s417_s1 + $0x18] sm:$0xff]  ;;  %v35_v11 = vld [vmem:[%s417_s1 + $0x20] sm:$0xff]  ;;  %s328_s25 = smov 8  }
   0x8   :  { %83 = vmatpush.msra.mxu0 %v39_v3  ;;  %291 = vmatpush.msra.mxu3 %v39_v3  ;;  %v284_v24 = vld [vmem:[%s416_s0] sm:$0xff]  ;;  %v286_v25 = vld [vmem:[%s416_s0 + $0x10] sm:$0xff]  ;;  %v285_v26 = vld [vmem:[%s416_s0 + $0x8] sm:$0xff] }
   0x9   :  { %256 = vmatmul.msk.f32.vlgmr.msra.gmra.mxu0 %vm43_vm0, %v31_v4  ;;  %261 = vmatmul.msk.f32.vlgmr.msra.gmra.mxu3 %vm43_vm0, %v36_v5  ;;  %v287_v27 = vld [vmem:[%s416_s0 + $0x18] sm:$0xff]  ;;  %v299_v28 = vld [vmem:[%s419_s3] ss:$0 sm:$0xff]  ;;  %s326_s0 = smov [#allocation3]  }
   0xa   :  { %s242_s3 = sshll.u32 %s326_s0, 4  ;;  %s243_s3 = int_to_ptr.vmem [resolvable:$true] %s242_s3 }
  0x11   :  { %257 = vmatmul.msk.f32.gmra.mxu0 %vm43_vm0, %v32_v6  ;;  %262 = vmatmul.msk.f32.gmra.mxu3 %vm43_vm0, %v37_v7 }
  0x19   :  { %258 = vmatmul.msk.f32.gmra.mxu0 %vm43_vm0, %v33_v8  ;;  %263 = vmatmul.msk.f32.gmra.mxu3 %vm43_vm0, %v38_v9 }
  0x21   :  { %259 = vmatmul.msk.f32.gmra.mxu0 %vm43_vm0, %v34_v10 }
  0x29   :  { %260 = vmatmul.msk.f32.gmra.mxu0 %vm43_vm0, %v35_v11 }
  0x86   :  { %v85_v12 = vpop.f32.mrf.mxu0 }
  0x8c   :  { %v100_v13 = vpop.f32.mrf.mxu3 }
  0x8e   :  { %v88_v14 = vpop.f32.mrf.mxu0 }
  0x8f   :  { %v125_v23 = vpack.c.bf16 %v88_v14, %v85_v12 }
  0x94   :  { %v103_v15 = vpop.f32.mrf.mxu3 }
  0x96   :  { %v91_v16 = vpop.f32.mrf.mxu0 }
  0x9c   :  { %v106_v17 = vpop.f32.mrf.mxu3 }
  0x9d   :  { %v128_v18 = vpack.c.bf16 %v106_v17, %v103_v15 }
  0x9e   :  { %v94_v19 = vpop.f32.mrf.mxu0 }
  0x9f   :  { %166 = vmatpush.bf16.msra.mxu1 %v128_v18  ;;  %292 = vmatpush.bf16.msra.mxu2 %v128_v18  ;;  %v126_v22 = vpack.c.bf16 %v94_v19, %v91_v16 }
  0xa6   :  { %v97_v20 = vpop.f32.mrf.mxu0 }
  0xa7   :  { %v127_v21 = vpack.c.bf16 %v100_v13, %v97_v20 }
  0xa9   :  { %167 = vmatpush.bf16.msra.mxu1 %v127_v21  ;;  %293 = vmatpush.bf16.msra.mxu2 %v127_v21 }
  0xad   :  { %168 = vmatpush.bf16.msra.mxu1 %v126_v22  ;;  %294 = vmatpush.bf16.msra.mxu2 %v126_v22 }
  0xb1   :  { %169 = vmatpush.bf16.msra.mxu1 %v125_v23  ;;  %295 = vmatpush.bf16.msra.mxu2 %v125_v23 }
  0xb4   :  { %280 = vmatmul.msk.bf16.vlgmr.msra.gmra.mxu1 %vm149_vm1, %v284_v24  ;;  %282 = vmatmul.msk.bf16.vlgmr.msra.gmra.mxu2 %vm149_vm1, %v286_v25 }
  0xc4   :  { %281 = vmatmul.msk.bf16.gmra.mxu1 %vm149_vm1, %v285_v26  ;;  %283 = vmatmul.msk.bf16.gmra.mxu2 %vm149_vm1, %v287_v27 }
 0x131   :  { %v171_v29 = vpop.f32.mrf.mxu1 }
 0x132   :  { %v222_v30 = vadd.f32 %v299_v28, %v171_v29 }
 0x134   :  { %230 = vst [vmem:[#allocation3] sm:$0xff] %v222_v30 }
 0x137   :  { %v181_v31 = vpop.f32.mrf.mxu2 }
 0x138   :  { %v226_v32 = vadd.f32 %v299_v28, %v181_v31 }
 0x139   :  { %v173_v33 = vpop.f32.mrf.mxu1 }
 0x13a   :  { %234 = vst [vmem:[#allocation3 + $0x20] sm:$0xff] %v226_v32  ;;  %v223_v34 = vadd.f32 %v299_v28, %v173_v33 }
 0x13c   :  { %231 = vst [vmem:[#allocation3 + $0x8] sm:$0xff] %v223_v34 }
 0x13f   :  { %v183_v35 = vpop.f32.mrf.mxu2 }
 0x140   :  { %v227_v36 = vadd.f32 %v299_v28, %v183_v35 }
 0x141   :  { %v176_v37 = vpop.f32.mrf.mxu1 }
 0x142   :  { %235 = vst [vmem:[#allocation3 + $0x28] sm:$0xff] %v227_v36  ;;  %v224_v38 = vadd.f32 %v299_v28, %v176_v37 }
 0x144   :  { %232 = vst [vmem:[#allocation3 + $0x10] sm:$0xff] %v224_v38 }
 0x147   :  { %v186_v39 = vpop.f32.mrf.mxu2 }
 0x148   :  { %v228_v40 = vadd.f32 %v299_v28, %v186_v39 }
 0x149   :  { %v178_v41 = vpop.f32.mrf.mxu1 }
 0x14a   :  { %236 = vst [vmem:[#allocation3 + $0x30] sm:$0xff] %v228_v40  ;;  %v225_v42 = vadd.f32 %v299_v28, %v178_v41 }
 0x14c   :  { %233 = vst [vmem:[#allocation3 + $0x18] sm:$0xff] %v225_v42 }
 0x14f   :  { %v188_v43 = vpop.f32.mrf.mxu2 }
 0x150   :  { %v229_v44 = vadd.f32 %v299_v28, %v188_v43 }
 0x152   :  { %237 = vst [vmem:[#allocation3 + $0x38] sm:$0xff] %v229_v44 }
 0x153   :  { %250 = dma.vmem_to_hbm [thread:$0]  %s243_s3, 1024, %s245_s23, [#allocation4], %s327_s24, %s327_s24, %s328_s25  }
 0x154   :  { %324 = dma.done.wait [#allocation4], 1024  }
 0x155   :  { %325 = vsyncadd [#allocation4], 4294966272 }
 0x156   :  { %255 = vsyncpa [#allocation4], 1 }

</bundles_post_ra>
